<compile_context>
chip_gen: v6e
topology: v6e:2x2x1
jax: 0.10.0
libtpu: 0.0.40
codegen_flags: <defaults>
</compile_context>

<pallas_src>
import functools

import jax
import jax.numpy as jnp
from jax.experimental import pallas as pl
from jax.experimental.pallas import tpu as pltpu


def _round_up(x, m):
    return ((x + m - 1) // m) * m


def _cdiv(a, b):
    return -(-a // b)


def _itemsize(dt):
    return jnp.dtype(dt).itemsize


def _vmem_budget_bytes():
    """~75% of physical VMEM: ~96 MiB on v5e/v6e, ~48 MiB on v7x; safe fallback."""
    cap = 64 << 20  # conservative (v7x physical) if the query is unavailable
    try:
        info = pltpu.get_tpu_info()
        cap = int(getattr(info, "vmem_capacity_bytes", cap))
    except Exception:
        pass
    return min((cap * 3) // 4, 112 << 20)


def _plan_m(M, tm_req, align):
    """Balanced M tiling: tile <= tm_req, multiple of `align`; even tile count when
    >1 so the (parallel) M axis splits cleanly across 2 TensorCores on v7x."""
    M_a = _round_up(M, align)
    if M_a <= tm_req:
        return M_a, 1
    n = _cdiv(M_a, tm_req)
    if n > 1 and n % 2:
        n += 1
    tm = _round_up(_cdiv(M_a, n), align)
    return tm, n


def _plan_tiles(M, K_pad, N, *, tm_req, budget, in_bytes, out_bytes, m_align):
    """Pick (tm, n_m_tiles, tn, n_n_tiles) under a double-buffered VMEM budget.

    Preference: keep the whole padded N as a single tile (weight index constant ->
    fetched from HBM once), then maximize tm; only tile N when the resident weight
    plus one row-block would not fit the budget."""
    N128 = _round_up(N, 128)
    # 256-aligned N tiles when it costs no extra padding (v6e/v7x 256x256 MXU).
    n_align = 256 if (N128 >= 256 and N128 % 256 == 0) else 128
    N_al = _round_up(N, n_align)
    max_nn = _cdiv(N_al, n_align)

    for n_n in range(1, max_nn + 1):
        tn = N128 if n_n == 1 else _round_up(_cdiv(N_al, n_n), n_align)
        fixed = 2 * K_pad * tn * in_bytes + 2 * tn * 4            # weight + bias
        per_row = 2 * (K_pad * in_bytes + tn * out_bytes)         # patches + output
        avail = budget - fixed
        if avail >= m_align * per_row:
            tm_cap = max(m_align, (avail // per_row) // m_align * m_align)
            tm, n_m = _plan_m(M, min(tm_req, tm_cap), m_align)
            return tm, n_m, tn, n_n
    # Pathological fallback (enormous K): smallest tiles everywhere.
    tm, n_m = _plan_m(M, m_align, m_align)
    return tm, n_m, n_align, max_nn


def _patch_embed_kernel(x_ref, w_ref, b_ref, o_ref, *, scale):
    # x_ref: (tm, K_pad), w_ref: (K_pad, tn), b_ref: (1, tn) f32, o_ref: (tm, tn).
    acc = jnp.dot(x_ref[...], w_ref[...], preferred_element_type=jnp.float32)
    acc = acc + b_ref[...].astype(jnp.float32)
    if scale is not None:
        acc = acc * scale
    o_ref[...] = acc.astype(o_ref.dtype)


def patch_embed_super(x, weight, bias, *, patch_size, sample_embed_dim,
                      super_embed_dim, scale=False, tm=1024,
                      compute_dtype=jnp.bfloat16, out_dtype=None,
                      vmem_budget_bytes=None):
    """Forward of PatchembedSuper.

    x      : (B, C, H, W)                      NCHW, like PyTorch
    weight : (super_embed_dim, C, ph, pw)      full conv weight
    bias   : (super_embed_dim,)
    returns: (B, num_patches, sample_embed_dim), dtype out_dtype (default x.dtype)
    """
    B, C, H, W = x.shape
    ph, pw = patch_size
    assert H % ph == 0 and W % pw == 0, "image size must be divisible by patch size"
    gh, gw = H // ph, W // pw
    num_patches = gh * gw

    # --- sampled sub-weights (set_sample_config semantics) ---
    w_s = weight[:sample_embed_dim]                      # (E_s, C, ph, pw)
    b_s = bias[:sample_embed_dim]                        # (E_s,)
    sampled_scale = (super_embed_dim / sample_embed_dim) if scale else None

    K = C * ph * pw
    M = B * num_patches
    N = sample_embed_dim
    out_dtype = x.dtype if out_dtype is None else out_dtype

    # --- tile plan under an explicit VMEM budget ---
    in_bytes = _itemsize(compute_dtype)
    out_bytes = _itemsize(out_dtype)
    K_pad = _round_up(K, 128)

    sub = 8 * max(1, 4 // in_bytes)                      # 8 rows f32 / 16 rows bf16
    m_align = 128 if M >= 128 else sub
    tm_req = max(m_align, _round_up(tm, m_align))

    budget = _vmem_budget_bytes() if vmem_budget_bytes is None else int(vmem_budget_bytes)
    tm_eff, n_m, tn_eff, n_n = _plan_tiles(
        M, K_pad, N, tm_req=tm_req, budget=budget,
        in_bytes=in_bytes, out_bytes=out_bytes, m_align=m_align)
    M_pad = tm_eff * n_m
    N_pad = tn_eff * n_n

    # --- glue: extract non-overlapping patches, flatten in (C, ph, pw) order ---
    # (B, C, gh, ph, gw, pw) -> (B, gh, gw, C, ph, pw) -> (B*num_patches, C*ph*pw)
    patches = x.astype(compute_dtype).reshape(B, C, gh, ph, gw, pw)
    patches = jnp.transpose(patches, (0, 2, 4, 1, 3, 5)).reshape(M, K)
    if M_pad != M or K_pad != K:
        patches = jnp.pad(patches, ((0, M_pad - M), (0, K_pad - K)))

    w2d = w_s.reshape(sample_embed_dim, K).T.astype(compute_dtype)   # (K, E_s)
    if K_pad != K or N_pad != N:
        w2d = jnp.pad(w2d, ((0, K_pad - K), (0, N_pad - N)))
    b2d = b_s.astype(jnp.float32).reshape(1, N)
    if N_pad != N:
        b2d = jnp.pad(b2d, ((0, 0), (0, N_pad - N)))

    kernel = functools.partial(_patch_embed_kernel, scale=sampled_scale)

    footprint = 2 * (tm_eff * K_pad * in_bytes + K_pad * tn_eff * in_bytes
                     + tm_eff * tn_eff * out_bytes + tn_eff * 4)
    vmem_limit = int(max(budget, footprint + (2 << 20)))

    if n_n == 1:
        # Weight & bias block indices are constant -> DMA'd once, resident in VMEM.
        grid = (n_m,)
        in_specs = [
            pl.BlockSpec((tm_eff, K_pad), lambda i: (i, 0)),
            pl.BlockSpec((K_pad, N_pad), lambda i: (0, 0)),
            pl.BlockSpec((1, N_pad), lambda i: (0, 0)),
        ]
        out_specs = pl.BlockSpec((tm_eff, N_pad), lambda i: (i, 0))
        dim_sem = ("parallel",)
    else:
        # N outermost so the weight/bias index changes only n_n times total.
        grid = (n_n, n_m)
        in_specs = [
            pl.BlockSpec((tm_eff, K_pad), lambda j, i: (i, 0)),
            pl.BlockSpec((K_pad, tn_eff), lambda j, i: (0, j)),
            pl.BlockSpec((1, tn_eff), lambda j, i: (0, j)),
        ]
        out_specs = pl.BlockSpec((tm_eff, tn_eff), lambda j, i: (i, j))
        dim_sem = ("parallel", "parallel")

    out2d = pl.pallas_call(
        kernel,
        out_shape=jax.ShapeDtypeStruct((M_pad, N_pad), out_dtype),
        grid_spec=pltpu.PrefetchScalarGridSpec(
            num_scalar_prefetch=0,
            grid=grid,
            in_specs=in_specs,
            out_specs=out_specs,
        ),
        compiler_params=pltpu.CompilerParams(
            dimension_semantics=dim_sem,
            allow_input_fusion=[True, False, False],
            vmem_limit_bytes=vmem_limit,
        ),
    )(patches, w2d, b2d)

    out2d = out2d[:M, :N]
    return out2d.reshape(B, num_patches, N)


def _reference(x, weight, bias, *, patch_size, sample_embed_dim,
               super_embed_dim, scale):
    """Plain-JAX reference matching F.conv2d + flatten(2).transpose(1,2)."""
    w_s = weight[:sample_embed_dim]
    b_s = bias[:sample_embed_dim]
    out = jax.lax.conv_general_dilated(
        x, w_s, window_strides=patch_size, padding="VALID",
        dimension_numbers=("NCHW", "OIHW", "NCHW"),
        precision=jax.lax.Precision.HIGHEST)
    out = out + b_s[None, :, None, None]
    B, E, gh, gw = out.shape
    out = out.reshape(B, E, gh * gw).transpose(0, 2, 1)
    if scale:
        out = out * (super_embed_dim / sample_embed_dim)
    return out


if __name__ == "__main__":
    # Small, module-consistent shapes: img 16x16, patch 4x4, 4 input chans,
    # super embed dim 32, sampled embed dim 24, batch 2.
    B, C, H, W = 2, 4, 16, 16
    patch_size = (4, 4)
    super_embed_dim = 32
    sample_embed_dim = 24
    use_scale = True

    key = jax.random.PRNGKey(0)
    kx, kw, kb = jax.random.split(key, 3)
    x = jax.random.normal(kx, (B, C, H, W), dtype=jnp.float32)
    weight = jax.random.normal(
        kw, (super_embed_dim, C, patch_size[0], patch_size[1]),
        dtype=jnp.float32) * 0.05
    bias = jax.random.normal(kb, (super_embed_dim,), dtype=jnp.float32) * 0.05

    ref = _reference(
        x, weight, bias,
        patch_size=patch_size,
        sample_embed_dim=sample_embed_dim,
        super_embed_dim=super_embed_dim,
        scale=use_scale,
    )

    common = dict(patch_size=patch_size,
                  sample_embed_dim=sample_embed_dim,
                  super_embed_dim=super_embed_dim,
                  scale=use_scale)
    num_patches = (H // patch_size[0]) * (W // patch_size[1])

    # f32 compute path (tight tolerance).
    out_f32 = patch_embed_super(x, weight, bias, compute_dtype=jnp.float32, **common)
    out_f32 = jax.block_until_ready(out_f32)
    assert out_f32.shape == (B, num_patches, sample_embed_dim)
    assert jnp.allclose(out_f32, ref, atol=1e-3, rtol=1e-3)

    # bf16 compute path (default; f32 accumulation, relaxed tolerance).
    out_bf16 = patch_embed_super(x, weight, bias, **common)
    out_bf16 = jax.block_until_ready(out_bf16)
    assert out_bf16.shape == (B, num_patches, sample_embed_dim)
    assert jnp.allclose(out_bf16, ref, atol=5e-2, rtol=5e-2)

    # bf16 output option (opt-in; halves the dominant output HBM stream on v5e).
    out_bf16_out = patch_embed_super(x, weight, bias, out_dtype=jnp.bfloat16, **common)
    out_bf16_out = jax.block_until_ready(out_bf16_out)
    assert out_bf16_out.shape == (B, num_patches, sample_embed_dim)
    assert jnp.allclose(out_bf16_out.astype(jnp.float32), ref, atol=7e-2, rtol=7e-2)

    print("KERNEL_OK")
</pallas_src>

<mosaic_0001>
module attributes {stable_mosaic.version = 11 : i64} {
  func.func @_patch_embed_kernel(%arg0: i32, %arg1: memref<32x128xf32, #tpu.memory_space<vmem>>, %arg2: memref<128x128xf32, #tpu.memory_space<vmem>>, %arg3: memref<1x128xf32, #tpu.memory_space<vmem>>, %arg4: memref<32x128xf32, #tpu.memory_space<vmem>>) attributes {dimension_semantics = [#tpu.dimension_semantics<parallel>], iteration_bounds = array<i64: 1>, scalar_prefetch = 0 : i64, scratch_operands = 0 : i64, tpu.core_type = #tpu.core_type<tc>, window_params = [{transform_indices = @transform_0, window_bounds = array<i64: 32, 128>}, {pipeline_mode = #tpu.pipeline_mode<synchronous>, transform_indices = @transform_1, window_bounds = array<i64: 128, 128>}, {pipeline_mode = #tpu.pipeline_mode<synchronous>, transform_indices = @transform_2, window_bounds = array<i64: 1, 128>}, {transform_indices = @transform_3, window_bounds = array<i64: 32, 128>}]} {
    %c0 = arith.constant 0 : index
    %c0_0 = arith.constant 0 : index
    %0 = vector.load %arg1[%c0, %c0_0] : memref<32x128xf32, #tpu.memory_space<vmem>>, vector<32x128xf32>
    %c0_1 = arith.constant 0 : index
    %c0_2 = arith.constant 0 : index
    %1 = vector.load %arg2[%c0_1, %c0_2] : memref<128x128xf32, #tpu.memory_space<vmem>>, vector<128x128xf32>
    %cst = arith.constant dense<0.000000e+00> : vector<32x128xf32>
    %2 = tpu.matmul %0, %1, %cst {dimension_numbers = #tpu.dot_dimension_numbers<[1], [0], [0], [1], [0, 0, 1, 1], [], []>} : vector<32x128xf32>, vector<128x128xf32>, vector<32x128xf32> -> vector<32x128xf32>
    %c0_3 = arith.constant 0 : index
    %c0_4 = arith.constant 0 : index
    %3 = vector.load %arg3[%c0_3, %c0_4] : memref<1x128xf32, #tpu.memory_space<vmem>>, vector<1x128xf32>
    %4 = vector.broadcast %3 : vector<1x128xf32> to vector<32x128xf32>
    %5 = arith.addf %2, %4 : vector<32x128xf32>
    %cst_5 = arith.constant 1.33333337 : f32
    %6 = vector.broadcast %cst_5 : f32 to vector<32x128xf32>
    %7 = arith.mulf %5, %6 : vector<32x128xf32>
    %c0_6 = arith.constant 0 : index
    %c0_7 = arith.constant 0 : index
    %8 = vector.load %arg4[%c0_6, %c0_7] : memref<32x128xf32, #tpu.memory_space<vmem>>, vector<32x128xf32>
    tpu.vector_store %arg4[%c0_6, %c0_7], %7 {strides = array<i32>} : memref<32x128xf32, #tpu.memory_space<vmem>>, vector<32x128xf32>,
    return
  }
  func.func @transform_0(%arg0: i32) -> (i32, i32) {
    %c0_i32 = arith.constant 0 : i32
    %c0_i32_0 = arith.constant 0 : i32
    return %arg0, %c0_i32 : i32, i32
  }
  func.func @transform_1(%arg0: i32) -> (i32, i32) {
    %c0_i32 = arith.constant 0 : i32
    %c0_i32_0 = arith.constant 0 : i32
    %c0_i32_1 = arith.constant 0 : i32
    return %c0_i32, %c0_i32_0 : i32, i32
  }
  func.func @transform_2(%arg0: i32) -> (i32, i32) {
    %c0_i32 = arith.constant 0 : i32
    %c0_i32_0 = arith.constant 0 : i32
    %c0_i32_1 = arith.constant 0 : i32
    return %c0_i32, %c0_i32_0 : i32, i32
  }
  func.func @transform_3(%arg0: i32) -> (i32, i32) {
    %c0_i32 = arith.constant 0 : i32
    %c0_i32_0 = arith.constant 0 : i32
    return %arg0, %c0_i32 : i32, i32
  }
}

</mosaic_0001>

<bundles_post_ra>
// kernel: tpu_custom_call.1
= control target key start
LH: loop header
LB: loop body
LE: loop exit
PB: predicated region body
PF: predicated region fallthrough
CT: control target
= control target key end

     0   :  { %8 = vsyncpa [#allocation3], 0  ;;  %s389_s0 = inlined_call_operand.hbm [shape: f32[32,128], index: 0, kind: input, shape index: {}]   ;;  %s390_s1 = inlined_call_operand.hbm [shape: f32[128,128], index: 1, kind: input, shape index: {}]   ;;  %s391_s2 = inlined_call_operand.vmem [shape: f32[1,128], index: 2, kind: input, shape index: {}]   ;;  %s392_s3 = inlined_call_operand.hbm [shape: f32[32,128], index: 3, kind: output, shape index: {}]  }
   0x1   :  { %9 = vsyncpa [#allocation6], 0 }
   0x2   :  { %10 = vsyncpa [#allocation4], 0  ;;  %s343_s12 = smov [#allocation2]  }
   0x3   :  { %s16_s13 = sshll.u32 %s343_s12, 4  ;;  %s17_s13 = int_to_ptr.vmem [resolvable:$true] %s16_s13 }
   0x4   :  { %s285_s14 = scalar_lea.vmem %s17_s13, 512  ;;  %p290_p1 = scmp.lt.s32.totalorder %s17_s13, %s17_s13 }
   0x5   :  { %p286_p0 = scmp.ne.s32.totalorder %s17_s13, %s285_s14  ;;  %p291_p2 = scmp.lt.s32.totalorder %s285_s14, %s285_s14 }
   0x7   :  { %p292_p3 = por %p291_p2, %p290_p1 }
   0x9   :  { %p293_p4 = pnand %p292_p3, %p286_p0 }
   0xb   :  { %296 = shalt.err (!%p293_p4)
}
   0xc   :  { %s344_s15 = smov 128   ;;  %s345_s16 = smov 8  }
   0xd   :  { %22 = dma.hbm_to_vmem [thread:$0]  %s389_s0, 512, %s17_s13, [#allocation3], %s344_s15, %s344_s15, %s345_s16  }
   0xe   :  { %s346_s19 = smov [#allocation5]  }
   0xf   :  { %s28_s20 = sshll.u32 %s346_s19, 4  ;;  %s29_s20 = int_to_ptr.vmem [resolvable:$true] %s28_s20 }
  0x10   :  { %s305_s21 = scalar_lea.vmem %s29_s20, 2048  ;;  %p310_p6 = scmp.lt.s32.totalorder %s29_s20, %s29_s20 }
  0x11   :  { %p306_p5 = scmp.ne.s32.totalorder %s29_s20, %s305_s21  ;;  %p311_p7 = scmp.lt.s32.totalorder %s305_s21, %s305_s21 }
  0x13   :  { %p312_p8 = por %p311_p7, %p310_p6 }
  0x15   :  { %p313_p9 = pnand %p312_p8, %p306_p5 }
  0x17   :  { %316 = shalt.err (!%p313_p9)
}
  0x18   :  { %34 = dma.hbm_to_vmem [thread:$0]  %s390_s1, 2048, %s29_s20, [#allocation6], %s344_s15, %s344_s15, %s345_s16  }
  0x19   :  { %337 = dma.done.wait [#allocation3], 512  }
  0x1a   :  { %338 = vsyncadd [#allocation3], 4294966784 }
  0x1b   :  { %339 = dma.done.wait [#allocation6], 2048  }
  0x1c   :  { %340 = vsyncadd [#allocation6], 4294965248  ;;  %v62_v0 = vld [vmem:[#allocation5 + $0x78] sm:$0xff]  ;;  %v61_v1 = vld [vmem:[#allocation5 + $0x70] sm:$0xff]  ;;  %s347_s24 = smov [#allocation7]  }
  0x1d   :  { %202 = vmatprep.subr.mxu0 %v62_v0  ;;  %240 = vmatprep.subr.mxu1 %v62_v0  ;;  %v60_v2 = vld [vmem:[#allocation5 + $0x68] sm:$0xff]  ;;  %v59_v3 = vld [vmem:[#allocation5 + $0x60] sm:$0xff]  ;;  %v58_v4 = vld [vmem:[#allocation5 + $0x58] sm:$0xff]  ;;  %s168_s25 = sshll.u32 %s347_s24, 4  ;;  %s169_s25 = int_to_ptr.vmem [resolvable:$true] %s168_s25 }
  0x1e   :  { %203 = vmatpush3.msra.mxu0 %v62_v0  ;;  %256 = vmatpush3.msra.mxu1 %v62_v0  ;;  %v57_v5 = vld [vmem:[#allocation5 + $0x50] sm:$0xff]  ;;  %v56_v6 = vld [vmem:[#allocation5 + $0x48] sm:$0xff]  ;;  %v55_v7 = vld [vmem:[#allocation5 + $0x40] sm:$0xff]  ;;  %p322_p11 = scmp.lt.s32.totalorder %s169_s25, %s169_s25 }
  0x1f   :  { %204 = vmatprep.subr.mxu0 %v61_v1  ;;  %241 = vmatprep.subr.mxu1 %v61_v1  ;;  %v54_v8 = vld [vmem:[#allocation5 + $0x38] sm:$0xff]  ;;  %v53_v9 = vld [vmem:[#allocation5 + $0x30] sm:$0xff]  ;;  %v52_v10 = vld [vmem:[#allocation5 + $0x28] sm:$0xff] }
  0x20   :  { %205 = vmatpush3.msra.mxu0 %v61_v1  ;;  %257 = vmatpush3.msra.mxu1 %v61_v1  ;;  %v51_v11 = vld [vmem:[#allocation5 + $0x20] sm:$0xff]  ;;  %v50_v12 = vld [vmem:[#allocation5 + $0x18] sm:$0xff]  ;;  %v49_v13 = vld [vmem:[#allocation5 + $0x10] sm:$0xff] }
  0x21   :  { %206 = vmatprep.subr.mxu0 %v60_v2  ;;  %242 = vmatprep.subr.mxu1 %v60_v2  ;;  %v48_v14 = vld [vmem:[#allocation5 + $0x8] sm:$0xff]  ;;  %v47_v15 = vld [vmem:[#allocation5] sm:$0xff]  ;;  %v45_v17 = vld [vmem:[#allocation2 + $0x10] sm:$0xff] }
  0x22   :  { %207 = vmatpush3.msra.mxu0 %v60_v2  ;;  %258 = vmatpush3.msra.mxu1 %v60_v2  ;;  %v43_v16 = vld [vmem:[#allocation2] sm:$0xff]  ;;  %v44_v18 = vld [vmem:[#allocation2 + $0x8] sm:$0xff]  ;;  %v46_v19 = vld [vmem:[#allocation2 + $0x18] sm:$0xff] }
  0x23   :  { %208 = vmatprep.subr.mxu0 %v59_v3  ;;  %243 = vmatprep.subr.mxu1 %v59_v3  ;;  %v181_v20 = vld [vmem:[%s391_s2] ss:$0 sm:$0xff]  ;;  %s317_s2 = scalar_lea.vmem %s169_s25, 512 }
  0x24   :  { %209 = vmatpush3.msra.mxu0 %v59_v3  ;;  %259 = vmatpush3.msra.mxu1 %v59_v3  ;;  %p318_p10 = scmp.ne.s32.totalorder %s169_s25, %s317_s2  ;;  %p323_p12 = scmp.lt.s32.totalorder %s317_s2, %s317_s2 }
  0x25   :  { %210 = vmatprep.subr.mxu0 %v58_v4  ;;  %244 = vmatprep.subr.mxu1 %v58_v4 }
  0x26   :  { %211 = vmatpush3.msra.mxu0 %v58_v4  ;;  %260 = vmatpush3.msra.mxu1 %v58_v4  ;;  %p324_p13 = por %p323_p12, %p322_p11 }
  0x27   :  { %212 = vmatprep.subr.mxu0 %v57_v5  ;;  %245 = vmatprep.subr.mxu1 %v57_v5 }
  0x28   :  { %213 = vmatpush3.msra.mxu0 %v57_v5  ;;  %261 = vmatpush3.msra.mxu1 %v57_v5  ;;  %p325_p0 = pnand %p324_p13, %p318_p10 }
  0x29   :  { %214 = vmatprep.subr.mxu0 %v56_v6  ;;  %246 = vmatprep.subr.mxu1 %v56_v6 }
  0x2a   :  { %215 = vmatpush3.msra.mxu0 %v56_v6  ;;  %262 = vmatpush3.msra.mxu1 %v56_v6 }
  0x2b   :  { %216 = vmatprep.subr.mxu0 %v55_v7  ;;  %247 = vmatprep.subr.mxu1 %v55_v7 }
  0x2c   :  { %217 = vmatpush3.msra.mxu0 %v55_v7  ;;  %263 = vmatpush3.msra.mxu1 %v55_v7 }
  0x2d   :  { %218 = vmatprep.subr.mxu0 %v54_v8  ;;  %248 = vmatprep.subr.mxu1 %v54_v8 }
  0x2e   :  { %219 = vmatpush3.msra.mxu0 %v54_v8  ;;  %264 = vmatpush3.msra.mxu1 %v54_v8 }
  0x2f   :  { %220 = vmatprep.subr.mxu0 %v53_v9  ;;  %249 = vmatprep.subr.mxu1 %v53_v9 }
  0x30   :  { %221 = vmatpush3.msra.mxu0 %v53_v9  ;;  %265 = vmatpush3.msra.mxu1 %v53_v9 }
  0x31   :  { %222 = vmatprep.subr.mxu0 %v52_v10  ;;  %250 = vmatprep.subr.mxu1 %v52_v10 }
  0x32   :  { %223 = vmatpush3.msra.mxu0 %v52_v10  ;;  %266 = vmatpush3.msra.mxu1 %v52_v10 }
  0x33   :  { %224 = vmatprep.subr.mxu0 %v51_v11  ;;  %251 = vmatprep.subr.mxu1 %v51_v11 }
  0x34   :  { %225 = vmatpush3.msra.mxu0 %v51_v11  ;;  %267 = vmatpush3.msra.mxu1 %v51_v11 }
  0x35   :  { %226 = vmatprep.subr.mxu0 %v50_v12  ;;  %252 = vmatprep.subr.mxu1 %v50_v12 }
  0x36   :  { %227 = vmatpush3.msra.mxu0 %v50_v12  ;;  %268 = vmatpush3.msra.mxu1 %v50_v12 }
  0x37   :  { %228 = vmatprep.subr.mxu0 %v49_v13  ;;  %253 = vmatprep.subr.mxu1 %v49_v13 }
  0x38   :  { %229 = vmatpush3.msra.mxu0 %v49_v13  ;;  %269 = vmatpush3.msra.mxu1 %v49_v13 }
  0x39   :  { %230 = vmatprep.subr.mxu0 %v48_v14  ;;  %254 = vmatprep.subr.mxu1 %v48_v14 }
  0x3a   :  { %231 = vmatpush3.msra.mxu0 %v48_v14  ;;  %270 = vmatpush3.msra.mxu1 %v48_v14 }
  0x3b   :  { %232 = vmatprep.subr.mxu0 %v47_v15  ;;  %255 = vmatprep.subr.mxu1 %v47_v15 }
  0x3c   :  { %233 = vmatpush3.msra.mxu0 %v47_v15  ;;  %271 = vmatpush3.msra.mxu1 %v47_v15 }
  0x3d   :  { %234 = vmatprep.mubr.f32.mxu0 %v43_v16  ;;  %237 = vmatprep.mubr.f32.mxu1 %v45_v17 }
  0x3e   :  { %235 = vmatmul.mubr.f32.vlgmr.msra.gmra.mxu0 %v44_v18  ;;  %238 = vmatmul.mubr.f32.vlgmr.msra.gmra.mxu1 %v46_v19 }
  0xfe   :  { %v236_v21 = vpop.f32.mrf.mxu0  ;;  %v239_v22 = vpop.f32.mrf.mxu1 }
  0xff   :  { %v142_v23 = vadd.f32 %v236_v21, %v181_v20  ;;  %v152_v24 = vadd.f32 %v239_v22, %v181_v20 }
 0x100   :  { %v136_v25 = vpop.f32.mrf.mxu0  ;;  %v146_v26 = vpop.f32.mrf.mxu1 }
 0x101   :  { %v156_v27 = vmul.f32 1.3333334, %v142_v23  ;;  %v158_v28 = vmul.f32 1.3333334, %v152_v24  ;;  %v137_v29 = vadd.f32 %v181_v20, %v136_v25  ;;  %v147_v30 = vadd.f32 %v181_v20, %v146_v26 }
 0x103   :  { %160 = vst [vmem:[#allocation7 + $0x8] sm:$0xff] %v156_v27  ;;  %162 = vst [vmem:[#allocation7 + $0x18] sm:$0xff] %v158_v28  ;;  %v155_v31 = vmul.f32 1.3333334, %v137_v29  ;;  %v157_v32 = vmul.f32 1.3333334, %v147_v30 }
 0x105   :  { %159 = vst [vmem:[#allocation7] sm:$0xff] %v155_v31  ;;  %161 = vst [vmem:[#allocation7 + $0x10] sm:$0xff] %v157_v32 }
 0x106   :  { %328 = shalt.err (!%p325_p0)
}
 0x107   :  { %174 = dma.vmem_to_hbm [thread:$0]  %s169_s25, 512, %s392_s3, [#allocation4], %s344_s15, %s344_s15, %s345_s16  }
 0x108   :  { %341 = dma.done.wait [#allocation4], 512  }
 0x109   :  { %342 = vsyncadd [#allocation4], 4294966784 }
 0x10a   :  { %178 = vsyncpa [#allocation3], 1 }
 0x10b   :  { %179 = vsyncpa [#allocation6], 1 }
 0x10c   :  { %180 = vsyncpa [#allocation4], 1 }

</bundles_post_ra>
